<compile_context>
chip_gen: v7x
topology: tpu7x:2x2x1
jax: 0.10.0
libtpu: 0.0.40
codegen_flags: <defaults>
</compile_context>

<pallas_src>
import jax
import jax.numpy as jnp
from jax.experimental import pallas as pl
from jax.experimental.pallas import tpu as pltpu


def _round_up(a, m):
    return (a + m - 1) // m * m


def _vmem_budget():
    """Generation-aware VMEM limit and per-streamed-buffer budget (bytes)."""
    vmem_phys = 64 * 1024 * 1024  # conservative fallback = v7x floor
    try:
        vmem_phys = int(pltpu.get_tpu_info().vmem_capacity_bytes)
    except Exception:
        pass
    vmem_limit = min((vmem_phys * 3) // 4, 96 * 1024 * 1024)   # 48 MiB on v7x, 96 MiB on v5e/v6e
    x_buf_budget = min(16 * 1024 * 1024, vmem_limit // 4)      # 12 MiB on v7x, 16 MiB on v5e/v6e
    return vmem_limit, x_buf_budget


def _linear_packed_kernel(x_ref, w_ref, b_ref, o_ref):
    # x_ref: (TB, P*D=128) lane-dense packed tile (P original rows per packed row)
    # w_ref: (128, P) block-diagonal weight, resident across the grid
    # b_ref: (1,) scalar in SMEM; o_ref: (TB, P)
    # f32 inputs use the exact f32 MXU path; bf16 inputs hit the MXU natively.
    acc = jnp.dot(x_ref[...], w_ref[...], preferred_element_type=jnp.float32)
    o_ref[...] = (acc + b_ref[0]).astype(o_ref.dtype)


def _make_rowreduce_kernel(D):
    """Generic-D kernel: per-128-lane-chunk VPU multiply, VPU chunk accumulation,
    then a single XLU cross-lane reduce per tile (perf review item 7)."""
    nfull, rem = divmod(D, 128)

    def kernel(x_ref, w_ref, b_ref, o_ref):
        def chunk(lo, width):
            xc = x_ref[:, lo:lo + width].astype(jnp.float32)
            wc = w_ref[:, lo:lo + width].astype(jnp.float32)
            return xc * wc

        if nfull >= 1:
            acc = chunk(0, 128)
            for c in range(1, nfull):           # static unrolled VPU adds
                acc = acc + chunk(c * 128, 128)
            total = jnp.sum(acc, axis=-1, keepdims=True)
            if rem:
                total = total + jnp.sum(chunk(nfull * 128, rem), axis=-1, keepdims=True)
        else:
            total = jnp.sum(chunk(0, D), axis=-1, keepdims=True)
        o_ref[...] = (total + b_ref[0]).astype(o_ref.dtype)

    return kernel


def simple_nn_forward(x, weight, bias):
    """x: (B, D); weight: (1, D) (PyTorch nn.Linear layout); bias: (1,). Returns (B, 1) f32."""
    B, D = x.shape
    w = weight.reshape(1, D).astype(jnp.float32)
    b = bias.reshape(1).astype(jnp.float32)
    itemsize = jnp.dtype(x.dtype).itemsize

    # Lane folding factor: pack P original rows per 128-lane vreg row when D | 128.
    # Only taken when B % P == 0 so we never jnp.pad (copy) x in HBM.
    P = 128 // D if (D < 128 and 128 % D == 0) else 1
    if P > 1 and B % P != 0:
        P = 1

    rows = B // P                                  # rows of the (possibly packed) view
    lane_width = P * D
    d_lanes = _round_up(lane_width, 128)           # lanes occupied by one row's VMEM tile
    bytes_per_row = d_lanes * max(itemsize, 1)

    vmem_limit, x_buf_budget = _vmem_budget()
    tb_budget = max(8, (x_buf_budget // bytes_per_row) // 8 * 8)
    n_steps = pl.cdiv(rows, tb_budget)
    if rows >= 16:
        n_steps = max(n_steps, 2)                  # >=2 grid steps: v7x megacore can split batch
    TB = max(8, _round_up(pl.cdiv(rows, n_steps), 8))
    if TB >= rows:
        TB = rows                                  # full-extent block (allowed for any size)
    grid = (pl.cdiv(rows, TB),)                    # cdiv grid: boundary block is masked, no pad

    bias_spec = pl.BlockSpec(memory_space=pltpu.MemorySpace.SMEM)
    cparams = pltpu.CompilerParams(
        dimension_semantics=("parallel",),
        vmem_limit_bytes=vmem_limit,
    )
    cost = pl.CostEstimate(
        flops=2 * B * D,
        transcendentals=0,
        bytes_accessed=B * D * itemsize + B * 4 + D * 4 + 4,
    )

    if P > 1:
        # (B, D) -> (B/P, P*D): free row-major reshape; tiles are lane-dense.
        xp = x.reshape(rows, P * D)
        # Block-diagonal weight: column j holds w on rows j*D .. j*D+D-1.
        eye = jnp.eye(P, dtype=jnp.float32)
        w_blk = (eye[:, None, :] * w.reshape(-1)[None, :, None]).reshape(P * D, P)
        w_blk = w_blk.astype(x.dtype)              # bf16 inputs -> bf16 MXU feed

        out = pl.pallas_call(
            _linear_packed_kernel,
            out_shape=jax.ShapeDtypeStruct((rows, P), jnp.float32),
            grid_spec=pltpu.PrefetchScalarGridSpec(
                num_scalar_prefetch=0,
                grid=grid,
                in_specs=[
                    pl.BlockSpec((TB, P * D), lambda i: (i, 0)),   # streamed, double-buffered
                    pl.BlockSpec((P * D, P), lambda i: (0, 0)),    # resident weight
                    bias_spec,                                     # SMEM scalar bias
                ],
                out_specs=pl.BlockSpec((TB, P), lambda i: (i, 0)),
            ),
            compiler_params=cparams,
            cost_estimate=cost,
        )(xp, w_blk, b)
        return out.reshape(B, 1)                   # row r*P + j  <-  out[r, j]

    kernel = _make_rowreduce_kernel(D)
    out = pl.pallas_call(
        kernel,
        out_shape=jax.ShapeDtypeStruct((B, 1), jnp.float32),
        grid_spec=pltpu.PrefetchScalarGridSpec(
            num_scalar_prefetch=0,
            grid=grid,
            in_specs=[
                pl.BlockSpec((TB, D), lambda i: (i, 0)),           # streamed, double-buffered
                pl.BlockSpec((1, D), lambda i: (0, 0)),            # resident weight row
                bias_spec,                                         # SMEM scalar bias
            ],
            out_specs=pl.BlockSpec((TB, 1), lambda i: (i, 0)),
        ),
        compiler_params=cparams,
        cost_estimate=cost,
    )(x, w, b)
    return out


def _ref_forward(x, weight, bias):
    return x.astype(jnp.float32) @ weight.T.astype(jnp.float32) + bias.astype(jnp.float32)


if __name__ == "__main__":
    key = jax.random.PRNGKey(0)
    k_x, k_w, k_b, k_x2, k_w2, k_b2, k_x3 = jax.random.split(key, 7)

    # Case 1: D=32 (divides 128), B % P == 0 -> lane-folded MXU path.
    batch, input_size = 64, 32
    bound = 1.0 / jnp.sqrt(jnp.float32(input_size))
    weight = jax.random.uniform(k_w, (1, input_size), jnp.float32, -bound, bound)
    bias = jax.random.uniform(k_b, (1,), jnp.float32, -bound, bound)
    x = jax.random.normal(k_x, (batch, input_size), jnp.float32)

    out = jax.block_until_ready(simple_nn_forward(x, weight, bias))
    ref = _ref_forward(x, weight, bias)
    assert out.shape == (batch, 1)
    assert jnp.allclose(out, ref, atol=2e-5, rtol=2e-5)

    # Case 2: D=200 (not a divisor of 128) -> chunked VPU multiply + single lane reduce.
    batch2, input_size2 = 48, 200
    bound2 = 1.0 / jnp.sqrt(jnp.float32(input_size2))
    weight2 = jax.random.uniform(k_w2, (1, input_size2), jnp.float32, -bound2, bound2)
    bias2 = jax.random.uniform(k_b2, (1,), jnp.float32, -bound2, bound2)
    x2 = jax.random.normal(k_x2, (batch2, input_size2), jnp.float32)

    out2 = jax.block_until_ready(simple_nn_forward(x2, weight2, bias2))
    ref2 = _ref_forward(x2, weight2, bias2)
    assert out2.shape == (batch2, 1)
    assert jnp.allclose(out2, ref2, atol=2e-5, rtol=2e-5)

    # Case 3: D=32 but B not a multiple of P -> generic path, non-divisible cdiv grid.
    batch3 = 37
    x3 = jax.random.normal(k_x3, (batch3, input_size), jnp.float32)
    out3 = jax.block_until_ready(simple_nn_forward(x3, weight, bias))
    ref3 = _ref_forward(x3, weight, bias)
    assert out3.shape == (batch3, 1)
    assert jnp.allclose(out3, ref3, atol=2e-5, rtol=2e-5)

    print("KERNEL_OK")
</pallas_src>

<mosaic_0001>
module attributes {stable_mosaic.version = 11 : i64} {
  func.func @_linear_packed_kernel(%arg0: i32, %arg1: memref<8x128xf32, #tpu.memory_space<vmem>>, %arg2: memref<128x4xf32, #tpu.memory_space<vmem>>, %arg3: memref<1xf32, #tpu.memory_space<smem>>, %arg4: memref<8x4xf32, #tpu.memory_space<vmem>>) attributes {dimension_semantics = [#tpu.dimension_semantics<parallel>], iteration_bounds = array<i64: 2>, scalar_prefetch = 0 : i64, scratch_operands = 0 : i64, tpu.core_type = #tpu.core_type<tc>, window_params = [{transform_indices = @transform_0, window_bounds = array<i64: 8, 128>}, {pipeline_mode = #tpu.pipeline_mode<synchronous>, transform_indices = @transform_1, window_bounds = array<i64: 128, 4>}, {transform_indices = @transform_2, window_bounds = array<i64: 1>}, {transform_indices = @transform_3, window_bounds = array<i64: 8, 4>}]} {
    %c0 = arith.constant 0 : index
    %c0_0 = arith.constant 0 : index
    %0 = vector.load %arg1[%c0, %c0_0] : memref<8x128xf32, #tpu.memory_space<vmem>>, vector<8x128xf32>
    %c0_1 = arith.constant 0 : index
    %c0_2 = arith.constant 0 : index
    %1 = vector.load %arg2[%c0_1, %c0_2] : memref<128x4xf32, #tpu.memory_space<vmem>>, vector<128x4xf32>
    %cst = arith.constant dense<0.000000e+00> : vector<8x4xf32>
    %2 = tpu.matmul %0, %1, %cst {dimension_numbers = #tpu.dot_dimension_numbers<[1], [0], [0], [1], [0, 0, 1, 1], [], []>} : vector<8x128xf32>, vector<128x4xf32>, vector<8x4xf32> -> vector<8x4xf32>
    %c0_3 = arith.constant 0 : index
    %3 = memref.load %arg3[%c0_3] : memref<1xf32, #tpu.memory_space<smem>>
    %4 = vector.broadcast %3 : f32 to vector<8x4xf32>
    %5 = arith.addf %2, %4 : vector<8x4xf32>
    %c0_4 = arith.constant 0 : index
    %c0_5 = arith.constant 0 : index
    %6 = vector.load %arg4[%c0_4, %c0_5] : memref<8x4xf32, #tpu.memory_space<vmem>>, vector<8x4xf32>
    tpu.vector_store %arg4[%c0_4, %c0_5], %5 {strides = array<i32>} : memref<8x4xf32, #tpu.memory_space<vmem>>, vector<8x4xf32>,
    return
  }
  func.func @transform_0(%arg0: i32) -> (i32, i32) {
    %c0_i32 = arith.constant 0 : i32
    %c0_i32_0 = arith.constant 0 : i32
    return %arg0, %c0_i32 : i32, i32
  }
  func.func @transform_1(%arg0: i32) -> (i32, i32) {
    %c0_i32 = arith.constant 0 : i32
    %c0_i32_0 = arith.constant 0 : i32
    %c0_i32_1 = arith.constant 0 : i32
    return %c0_i32, %c0_i32_0 : i32, i32
  }
  func.func @transform_2(%arg0: i32) -> i32 {
    %c0_i32 = arith.constant 0 : i32
    %c0_i32_0 = arith.constant 0 : i32
    return %c0_i32 : i32
  }
  func.func @transform_3(%arg0: i32) -> (i32, i32) {
    %c0_i32 = arith.constant 0 : i32
    %c0_i32_0 = arith.constant 0 : i32
    return %arg0, %c0_i32 : i32, i32
  }
}

</mosaic_0001>

<bundles_post_ra>
// kernel: tpu_custom_call.1
= control target key start
LH: loop header
LB: loop body
LE: loop exit
PB: predicated region body
PF: predicated region fallthrough
CT: control target
= control target key end

     0   :  { %s441_s14 = smov 0   ;;  %s510_s0 = inlined_call_operand.vmem [shape: f32[16,128], index: 0, kind: input, shape index: {}]   ;;  %s511_s1 = inlined_call_operand.vmem [shape: f32[128,4], index: 1, kind: input, shape index: {}]   ;;  %s512_s2 = inlined_call_operand.<no memory space> [shape: f32[1], index: 2, kind: input, shape index: {}]   ;;  %s513_s3 = inlined_call_operand.vmem [shape: f32[16,4], index: 3, kind: output, shape index: {}]  }
   0x1   :  { %8 = sst [smem:[#allocation2]] %s512_s2 }
   0x2 LB: > { %s311_s15 = sadd.s32 4294967295, %s413_s14   ;;  %p315_p0 = scmp.ge.s32.totalorder %s413_s14, 1  ;;  %s413_s14 = sphi %s441_s14, %s14_s14  }
   0x3   : > { %p137_p1 = scmp.lt.s32.totalorder %s413_s14, 3 }
   0x5   : > { %p138_p2 = pnand %p315_p0, %p137_p1 }
   0x6   : > { %v168_v0 = vld [vmem:[%s511_s1] sm:$0xff] (!%p138_p2)  ;;  %v169_v1 = vld [vmem:[%s511_s1 + $0x8] sm:$0xff] (!%p138_p2)  ;;  %v170_v2 = vld [vmem:[%s511_s1 + $0x10] sm:$0xff] (!%p138_p2)  ;;  %v415_v3 = vmov (!%p138_p2), 0.0|0.0   ;;  %vm416_vm0 = vmmov (!%p138_p2), 0   ;;  %v417_v6 = vmov (!%p138_p2), 0.0  }
   0x7   : > { %141 = sbr.rel (%p138_p2) target bundleno = 255 (0xff), region = 32  ;;  %372 = vmatprep.subr.bf16.mxu0 (!%p138_p2), %v415_v3  ;;  %v373_v4 = vpack.c.bf16 (!%p138_p2), %v169_v1, %v168_v0  ;;  %v171_v5 = vld [vmem:[%s511_s1 + $0x18] sm:$0xff] (!%p138_p2)  ;;  %369 = vmatprep.mubr.msk.f32.mxu0 (!%p138_p2), %vm416_vm0, %v417_v6  ;;  %v172_v8 = vld [vmem:[%s511_s1 + $0x20] sm:$0xff] (!%p138_p2)  ;;  %v173_v9 = vld [vmem:[%s511_s1 + $0x28] sm:$0xff] (!%p138_p2)  ;;  %p159_p3 = scmp.lt.s32.totalorder (!%p138_p2), %s311_s15, 1  ;;  %vm256_vm1 = vcmask (!%p138_p2), 31744  }
   0x8   : > { %v376_v7 = vpack.c.bf16 (!%p138_p2), %v171_v5, %v170_v2  ;;  %v379_v10 = vpack.c.bf16 (!%p138_p2), %v173_v9, %v172_v8  ;;  %v174_v11 = vld [vmem:[%s511_s1 + $0x30] sm:$0xff] (!%p138_p2)  ;;  %v175_v12 = vld [vmem:[%s511_s1 + $0x38] sm:$0xff] (!%p138_p2)  ;;  %v176_v14 = vld [vmem:[%s511_s1 + $0x40] sm:$0xff] (!%p138_p2)  ;;  %s184_s25 = sld [smem:[#allocation2]] (!%p138_p2) }
   0x9   : > { %374 = vmatpush3.bf16.msra.mxu0 (!%p138_p2), %v373_v4  ;;  %v382_v13 = vpack.c.bf16 (!%p138_p2), %v175_v12, %v174_v11  ;;  %v177_v15 = vld [vmem:[%s511_s1 + $0x48] sm:$0xff] (!%p138_p2)  ;;  %v178_v17 = vld [vmem:[%s511_s1 + $0x50] sm:$0xff] (!%p138_p2)  ;;  %v179_v18 = vld [vmem:[%s511_s1 + $0x58] sm:$0xff] (!%p138_p2) }
   0xa   : > { %375 = vmatprep.subr.bf16.mxu0 (!%p138_p2), %v415_v3  ;;  %v385_v16 = vpack.c.bf16 (!%p138_p2), %v177_v15, %v176_v14  ;;  %v388_v19 = vpack.c.bf16 (!%p138_p2), %v179_v18, %v178_v17  ;;  %v180_v20 = vld [vmem:[%s511_s1 + $0x60] sm:$0xff] (!%p138_p2)  ;;  %v181_v21 = vld [vmem:[%s511_s1 + $0x68] sm:$0xff] (!%p138_p2)  ;;  %v182_v23 = vld [vmem:[%s511_s1 + $0x70] sm:$0xff] (!%p138_p2) }
   0xb   : > { %v391_v22 = vpack.c.bf16 (!%p138_p2), %v181_v21, %v180_v20  ;;  %v183_v24 = vld [vmem:[%s511_s1 + $0x78] sm:$0xff] (!%p138_p2) }
   0xc   : > { %v394_v25 = vpack.c.bf16 (!%p138_p2), %v183_v24, %v182_v23 }
   0xd   : > { %377 = vmatpush3.bf16.msra.mxu0 (!%p138_p2), %v376_v7 }
   0xe   : > { %378 = vmatprep.subr.bf16.mxu0 %v415_v3  ;;  %s515_s15 = smov (!%p159_p3, %s311_s15), 1  ;;  %v185_v27 = vstv %s184_s25 }
   0xf   : > { %s316_s21 = sshll.u32 %s515_s15, 3 }
  0x10   : > { %s162_s24 = scalar_lea.vmem %s510_s0, %s316_s21  ;;  %s166_s28 = scalar_lea.vmem %s513_s3, %s316_s21 }
  0x11   : > { %380 = vmatpush3.bf16.msra.mxu0 %v379_v10  ;;  %v167_v26 = vld [vmem:[%s162_s24] sm:$0xff] }
  0x12   : > { %381 = vmatprep.subr.bf16.mxu0 %v415_v3 }
  0x15   : > { %383 = vmatpush3.bf16.msra.mxu0 %v382_v13 }
  0x16   : > { %384 = vmatprep.subr.bf16.mxu0 %v415_v3 }
  0x19   : > { %386 = vmatpush3.bf16.msra.mxu0 %v385_v16 }
  0x1a   : > { %387 = vmatprep.subr.bf16.mxu0 %v415_v3 }
  0x1d   : > { %389 = vmatpush3.bf16.msra.mxu0 %v388_v19 }
  0x1e   : > { %390 = vmatprep.subr.bf16.mxu0 %v415_v3 }
  0x21   : > { %392 = vmatpush3.bf16.msra.mxu0 %v391_v22 }
  0x22   : > { %393 = vmatprep.subr.bf16.mxu0 %v415_v3 }
  0x25   : > { %395 = vmatpush3.bf16.msra.mxu0 %v394_v25 }
  0x28   : > { %370 = vmatmul.mubr.f32.vlgmr.msra.gmra.mrb[0].mxu0 %v167_v26 }
  0xfb   : > { %v252_v28 = vpop.f32.mrb[0].mxu0 }
  0xfc   : > { %v253_v29 = vadd.f32 %v252_v28, %v185_v27  ;;  %v371_v30 = vpop.f32.mrb[1].mxu0 }
  0xfe   : > { %257 = vst.msk [vmem:[%s166_s28] sm:$0xff] %vm256_vm1, %v253_v29 }
  0xff PF: > { %s14_s14 = sadd.s32 1, %s413_s14  }
 0x100   : > { %p11_p4 = scmp.ge.s32.totalorder %s14_s14, 4  }
 0x102   :  { %13 = sbr.rel (!%p11_p4) target bundleno = 2 (0x2), region = 62 }

</bundles_post_ra>
